<compile_context>
chip_gen: v7x
topology: tpu7x:2x2x1
jax: 0.10.0
libtpu: 0.0.40
codegen_flags: <defaults>
</compile_context>

<pallas_src>
import numpy as np
import jax
import jax.numpy as jnp
from jax.experimental import pallas as pl
from jax.experimental.pallas import tpu as pltpu


def _cdiv(a, b):
    return -(-a // b)


def _ctc_neg_kernel(x_ref, w_ref, m_ref, e_ref, out_ref):
    x = x_ref[...].astype(jnp.float32)        # (ts, lane_w) logits tile
    w = w_ref[...].astype(jnp.float32)        # (ts, lane_w) = 1 - target
    # Expand the per-original-row include mask to element granularity on the
    # (otherwise idle) MXU:  m_el[s, e] = mask[s, e // cls]  (exactly 0.0/1.0).
    m_el = jnp.dot(m_ref[...], e_ref[...], preferred_element_type=jnp.float32)
    # Per-element multilabel soft-margin term:
    #   -(y*logsig(x) + (1-y)*logsig(-x)) = (1-y)*x + softplus(-x)
    # softplus(-x) = max(-x, 0) + log1p(exp(-|x|))  -> 1 exp + 1 log1p / elem.
    sp = jnp.maximum(-x, 0.0) + jnp.log1p(jnp.exp(-jnp.abs(x)))
    # Select (not multiply): excluded crops, row padding and the OOB tail of a
    # partial boundary tile can never leak NaN/Inf into the partial sum.
    t = jnp.where(m_el > 0.5, w * x + sp, 0.0)
    # One f32 partial per tile, broadcast into a lane-aligned (8,128) block.
    out_ref[...] = jnp.full((8, 128), jnp.sum(t), dtype=jnp.float32)


def ctc_loss_neg(local_output, global_output, flags, cls_input, ncrops=10,
                 tile_rows=32768):
    b = flags.shape[0]
    nc = ncrops - 2
    cls = global_output.shape[-1]

    # ---- global-crop part (2b x cls elements): trivially small -> plain XLA.
    gx = global_output.reshape(2 * b, cls).astype(jnp.float32)
    gy = jnp.tile(cls_input.astype(jnp.float32), (2, 1))
    g_total = jnp.sum((1.0 - gy) * gx
                      + jnp.maximum(-gx, 0.0) + jnp.log1p(jnp.exp(-jnp.abs(gx))))

    # ---- local-crop part --------------------------------------------------
    # Logits keep their native crop-major row order (row r <-> crop=r//b,
    # i=r%b): the loss is a row-order-invariant sum, so no HBM transpose.
    R = nc * b
    lx = local_output.reshape(R, cls)
    # Only the small flags tensor is permuted so its row r matches lx row r.
    f = jnp.transpose(flags[:, 2:, :], (1, 0, 2)).reshape(R, cls + 1)
    w = (1.0 - f[:, 1:]).astype(jnp.bfloat16)                     # (R, cls)
    include = jnp.logical_and(f[:, 0] != 1.0,
                              jnp.max(f, axis=1) != jnp.min(f, axis=1))  # (R,)

    # Lane-dense super-row packing: rps original rows per 128-aligned row.
    lane_w = int(np.lcm(cls, 128))            # 640 for cls=20
    rps = lane_w // cls                       # 32 rows per super-row
    R_pad = rps * _cdiv(R, rps)
    R_super = R_pad // rps
    if R_super < 8:                           # keep matmul M >= 8 (tiny inputs)
        R_super = 8
        R_pad = rps * R_super
    if R_pad != R:                            # only copies when R % rps != 0
        lx = jnp.pad(lx, ((0, R_pad - R), (0, 0)))
        w = jnp.pad(w, ((0, R_pad - R), (0, 0)))
    x_s = lx.reshape(R_super, lane_w)
    w_s = w.reshape(R_super, lane_w)

    # Tile size in super-rows: big enough to amortise per-step overhead,
    # a multiple of 16 (bf16 sublane packing), and >= 2 tiles whenever possible
    # so both v7x TensorCores get a share of the "parallel" grid axis.
    if R_super <= 16:
        ts = R_super
    else:
        ts = max(16, (max(1, tile_rows // rps) // 16) * 16)
        ts = min(ts, 16 * ((R_super - 1) // 16))   # forces num_tiles >= 2
    num_tiles = _cdiv(R_super, ts)

    # Per-original-row include mask, padded so every mask read is in-bounds and
    # exactly zero past R (hard-excludes boundary-tile garbage).
    inc = jnp.pad(include, (0, num_tiles * ts * rps - R)).astype(jnp.float32)
    m_small = inc.reshape(num_tiles * ts, rps)

    # Constant 0/1 expand matrix: E[r, e] = 1 iff lane e belongs to row r.
    e_np = np.zeros((rps, lane_w), np.float32)
    for r in range(rps):
        e_np[r, r * cls:(r + 1) * cls] = 1.0
    expand = jnp.asarray(e_np)

    partials = pl.pallas_call(
        _ctc_neg_kernel,
        grid=(num_tiles,),
        in_specs=[
            pl.BlockSpec((ts, lane_w), lambda i: (i, 0)),    # logits tile
            pl.BlockSpec((ts, lane_w), lambda i: (i, 0)),    # (1 - target) tile
            pl.BlockSpec((ts, rps), lambda i: (i, 0)),       # include-mask tile
            pl.BlockSpec((rps, lane_w), lambda i: (0, 0)),   # expand const (resident)
        ],
        out_specs=pl.BlockSpec((None, 8, 128), lambda i: (i, 0, 0)),
        out_shape=jax.ShapeDtypeStruct((num_tiles, 8, 128), jnp.float32),
        compiler_params=pltpu.CompilerParams(
            dimension_semantics=("parallel",)),
    )(x_s, w_s, m_small, expand)

    # Epilogue: add the global term, apply the 1/cls (per-row class mean) once,
    # and divide by the count of contributing crops.
    total = (g_total + jnp.sum(partials[:, 0, 0])) / jnp.float32(cls)
    cnt = jnp.float32(2 * b) + jnp.sum(include.astype(jnp.float32))
    return total / cnt


ctc_loss_neg_jit = jax.jit(ctc_loss_neg, static_argnames=("ncrops", "tile_rows"))


# ---------------- pure numpy reference (mirrors the PyTorch loops) -----------
def _logsigmoid_np(x):
    return np.minimum(x, 0.0) - np.log1p(np.exp(-np.abs(x)))


def _msml_np(x, y):
    return -np.mean(y * _logsigmoid_np(x) + (1.0 - y) * _logsigmoid_np(-x))


def ref_loss(local_output, global_output, flags, cls_input, ncrops=10):
    b = flags.shape[0]
    cls = global_output.shape[-1]
    nc = ncrops - 2
    g = global_output.reshape(2, b, cls).transpose(1, 0, 2)
    l = local_output.reshape(nc, b, cls).transpose(1, 0, 2)
    total, cnt = 0.0, 0
    for i in range(b):
        for gi in range(2):
            total += _msml_np(g[i, gi], cls_input[i])
            cnt += 1
    for i in range(b):
        # (the torch.nonzero cls_label computation is dead code — dropped)
        for c in range(nc):
            tf = flags[i, c + 2]
            if tf[0] == 1:
                continue
            if len(np.unique(tf)) == 1:
                continue
            total += _msml_np(l[i, c], tf[1:])
            cnt += 1
    return total / cnt


if __name__ == "__main__":
    def make_inputs(key, b, ncrops, cls):
        nc = ncrops - 2
        k1, k2, k3, k4 = jax.random.split(key, 4)
        global_output = jax.random.normal(k1, (2 * b, cls), jnp.float32)
        local_output = jax.random.normal(k2, (nc * b, cls), jnp.float32)
        flags = jax.random.bernoulli(k3, 0.4, (b, ncrops, cls + 1)).astype(jnp.float32)
        cls_input = jax.random.bernoulli(k4, 0.3, (b, cls)).astype(jnp.float32)
        return local_output, global_output, flags, cls_input

    b, ncrops, cls = 2, 10, 20

    # small config (single tile, row padding to one lane-dense super-row block)
    lo, go, fl, ci = make_inputs(jax.random.PRNGKey(0), b, ncrops, cls)
    out = jax.block_until_ready(ctc_loss_neg_jit(lo, go, fl, ci, ncrops=ncrops))
    ref = ref_loss(np.asarray(lo), np.asarray(go), np.asarray(fl), np.asarray(ci),
                   ncrops=ncrops)
    assert abs(float(out) - float(ref)) < 1e-4, (float(out), float(ref))

    # larger config exercising the row grid (2 tiles + partial boundary tile)
    b2 = 70
    lo2, go2, fl2, ci2 = make_inputs(jax.random.PRNGKey(1), b2, ncrops, cls)
    out2 = jax.block_until_ready(
        ctc_loss_neg_jit(lo2, go2, fl2, ci2, ncrops=ncrops, tile_rows=256))
    ref2 = ref_loss(np.asarray(lo2), np.asarray(go2), np.asarray(fl2),
                    np.asarray(ci2), ncrops=ncrops)
    assert abs(float(out2) - float(ref2)) < 2e-3, (float(out2), float(ref2))

    # bf16 logits over HBM, f32 math inside the kernel
    out3 = jax.block_until_ready(
        ctc_loss_neg_jit(lo.astype(jnp.bfloat16), go.astype(jnp.bfloat16), fl, ci,
                         ncrops=ncrops))
    assert abs(float(out3) - float(ref)) < 5e-2, (float(out3), float(ref))

    print("KERNEL_OK")
</pallas_src>

<mosaic_0001>
module attributes {stable_mosaic.version = 11 : i64} {
  func.func @_ctc_neg_kernel(%arg0: i32, %arg1: memref<8x640xf32, #tpu.memory_space<vmem>>, %arg2: memref<8x640xbf16, #tpu.memory_space<vmem>>, %arg3: memref<8x32xf32, #tpu.memory_space<vmem>>, %arg4: memref<32x640xf32, #tpu.memory_space<vmem>>, %arg5: memref<1x8x128xf32, #tpu.memory_space<vmem>>) attributes {dimension_semantics = [#tpu.dimension_semantics<parallel>], iteration_bounds = array<i64: 1>, scalar_prefetch = 0 : i64, scratch_operands = 0 : i64, tpu.core_type = #tpu.core_type<tc>, window_params = [{transform_indices = @transform_0, window_bounds = array<i64: 8, 640>}, {transform_indices = @transform_1, window_bounds = array<i64: 8, 640>}, {transform_indices = @transform_2, window_bounds = array<i64: 8, 32>}, {pipeline_mode = #tpu.pipeline_mode<synchronous>, transform_indices = @transform_3, window_bounds = array<i64: 32, 640>}, {transform_indices = @transform_4, window_bounds = array<i64: 1, 8, 128>}]} {
    %c0 = arith.constant 0 : index
    %c0_0 = arith.constant 0 : index
    %0 = vector.load %arg1[%c0, %c0_0] : memref<8x640xf32, #tpu.memory_space<vmem>>, vector<8x640xf32>
    %c0_1 = arith.constant 0 : index
    %c0_2 = arith.constant 0 : index
    %1 = vector.load %arg2[%c0_1, %c0_2] : memref<8x640xbf16, #tpu.memory_space<vmem>>, vector<8x640xbf16>
    %2 = arith.extf %1 : vector<8x640xbf16> to vector<8x640xf32>
    %c0_3 = arith.constant 0 : index
    %c0_4 = arith.constant 0 : index
    %3 = vector.load %arg3[%c0_3, %c0_4] : memref<8x32xf32, #tpu.memory_space<vmem>>, vector<8x32xf32>
    %c0_5 = arith.constant 0 : index
    %c0_6 = arith.constant 0 : index
    %4 = vector.load %arg4[%c0_5, %c0_6] : memref<32x640xf32, #tpu.memory_space<vmem>>, vector<32x640xf32>
    %cst = arith.constant dense<0.000000e+00> : vector<8x640xf32>
    %5 = tpu.matmul %3, %4, %cst {dimension_numbers = #tpu.dot_dimension_numbers<[1], [0], [0], [1], [0, 0, 1, 1], [], []>} : vector<8x32xf32>, vector<32x640xf32>, vector<8x640xf32> -> vector<8x640xf32>
    %cst_7 = arith.constant 0.000000e+00 : f32
    %6 = vector.broadcast %cst_7 : f32 to vector<8x640xf32>
    %7 = arith.subf %6, %0 : vector<8x640xf32>
    %cst_8 = arith.constant 0.000000e+00 : f32
    %8 = vector.broadcast %cst_8 : f32 to vector<8x640xf32>
    %9 = arith.maximumf %7, %8 : vector<8x640xf32>
    %10 = math.absf %0 : vector<8x640xf32>
    %cst_9 = arith.constant 0.000000e+00 : f32
    %11 = vector.broadcast %cst_9 : f32 to vector<8x640xf32>
    %12 = arith.subf %11, %10 : vector<8x640xf32>
    %13 = math.exp %12 : vector<8x640xf32>
    %14 = math.log1p %13 : vector<8x640xf32>
    %15 = arith.addf %9, %14 : vector<8x640xf32>
    %cst_10 = arith.constant 5.000000e-01 : f32
    %16 = vector.broadcast %cst_10 : f32 to vector<8x640xf32>
    %17 = arith.cmpf ogt, %5, %16 : vector<8x640xf32>
    %18 = arith.mulf %2, %0 : vector<8x640xf32>
    %19 = arith.addf %18, %15 : vector<8x640xf32>
    %cst_11 = arith.constant 0.000000e+00 : f32
    %20 = vector.broadcast %cst_11 : f32 to vector<8x640xf32>
    %21 = arith.select %17, %19, %20 : vector<8x640xi1>, vector<8x640xf32>
    %22 = vector.shape_cast %21 : vector<8x640xf32> to vector<1x8x640xf32>
    %cst_12 = arith.constant dense<0.000000e+00> : vector<1xf32>
    %23 = vector.multi_reduction <add>, %22, %cst_12 [1, 2] : vector<1x8x640xf32> to vector<1xf32>
    %24 = vector.shape_cast %23 : vector<1xf32> to vector<1x1x1xf32>
    %25 = vector.extract %24[0, 0, 0] : f32 from vector<1x1x1xf32>
    %26 = vector.broadcast %25 : f32 to vector<8x128xf32>
    %c0_13 = arith.constant 0 : index
    %c0_14 = arith.constant 0 : index
    %c0_15 = arith.constant 0 : index
    %27 = vector.load %arg5[%c0_13, %c0_14, %c0_15] : memref<1x8x128xf32, #tpu.memory_space<vmem>>, vector<1x8x128xf32>
    %28 = vector.shape_cast %27 : vector<1x8x128xf32> to vector<8x128xf32>
    %29 = vector.shape_cast %26 : vector<8x128xf32> to vector<1x8x128xf32>
    tpu.vector_store %arg5[%c0_13, %c0_14, %c0_15], %29 {strides = array<i32>} : memref<1x8x128xf32, #tpu.memory_space<vmem>>, vector<1x8x128xf32>,
    return
  }
  func.func @transform_0(%arg0: i32) -> (i32, i32) {
    %c0_i32 = arith.constant 0 : i32
    %c0_i32_0 = arith.constant 0 : i32
    return %arg0, %c0_i32 : i32, i32
  }
  func.func @transform_1(%arg0: i32) -> (i32, i32) {
    %c0_i32 = arith.constant 0 : i32
    %c0_i32_0 = arith.constant 0 : i32
    return %arg0, %c0_i32 : i32, i32
  }
  func.func @transform_2(%arg0: i32) -> (i32, i32) {
    %c0_i32 = arith.constant 0 : i32
    %c0_i32_0 = arith.constant 0 : i32
    return %arg0, %c0_i32 : i32, i32
  }
  func.func @transform_3(%arg0: i32) -> (i32, i32) {
    %c0_i32 = arith.constant 0 : i32
    %c0_i32_0 = arith.constant 0 : i32
    %c0_i32_1 = arith.constant 0 : i32
    return %c0_i32, %c0_i32_0 : i32, i32
  }
  func.func @transform_4(%arg0: i32) -> (i32, i32, i32) {
    %c0_i32 = arith.constant 0 : i32
    %c0_i32_0 = arith.constant 0 : i32
    %c0_i32_1 = arith.constant 0 : i32
    return %arg0, %c0_i32, %c0_i32_0 : i32, i32, i32
  }
}

</mosaic_0001>

<bundles_post_ra>
// kernel: ne.1
= control target key start
LH: loop header
LB: loop body
LE: loop exit
PB: predicated region body
PF: predicated region fallthrough
CT: control target
= control target key end

     0   :  { %v15_v2 = vmov 0   ;;  %s40_s0 = inlined_call_operand.vmem [shape: f32[8,2], index: 0, kind: input, shape index: {}]   ;;  %s41_s1 = inlined_call_operand.vmem [shape: f32[8,2], index: 1, kind: input, shape index: {}]   ;;  %s42_s2 = inlined_call_operand.vmem [shape: pred[8,2], index: 2, kind: output, shape index: {}]  }
   0x1   :  { %v3_v0 = vld [vmem:[%s40_s0] sm:$0xff] }
   0x2   :  { %v4_v1 = vld [vmem:[%s41_s1] sm:$0xff] }
   0x3   :  { %vm7_vm0 = vcmp.ne.f32.partialorder %v3_v0, %v4_v1 }
   0x4   :  { %v8_v3 = vsel %vm7_vm0, 1, %v15_v2 }
   0x5   :  { %v10_v4 = vpack.c.b16 %v15_v2, %v8_v3 }
   0x7   :  { %v11_v5 = vpack.c.b8 %v15_v2, %v10_v4 }
   0x9   :  { %13 = vst [vmem:[%s42_s2] sm:$0x3] %v11_v5 }

// kernel: ctc_loss_neg.1
= control target key start
LH: loop header
LB: loop body
LE: loop exit
PB: predicated region body
PF: predicated region fallthrough
CT: control target
= control target key end

     0   :  { %v452_v3 = vmov 0.0   ;;  %vm51_vm0 = vcmask 261120   ;;  %v453_v29 = vmov 0.0|0.0   ;;  %vm454_vm1 = vmmov 0   ;;  %s631_s3 = inlined_call_operand.vmem [shape: f32[32,640], index: 3, kind: input, shape index: {}]   ;;  %s632_s2 = inlined_call_operand.vmem [shape: f32[8,32], index: 2, kind: input, shape index: {}]   ;;  %s633_s0 = inlined_call_operand.vmem [shape: f32[8,640], index: 0, kind: input, shape index: {}]   ;;  %s634_s1 = inlined_call_operand.vmem [shape: bf16[8,640], index: 1, kind: input, shape index: {}]   ;;  %s635_s4 = inlined_call_operand.vmem [shape: f32[1,8,128], index: 4, kind: output, shape index: {}]  }
   0x1   :  { %v32_v0 = vld [vmem:[%s631_s3 + $0x8] sm:$0xff]  ;;  %v37_v1 = vld [vmem:[%s631_s3 + $0x30] sm:$0xff]  ;;  %v31_v2 = vld [vmem:[%s631_s3] sm:$0xff]  ;;  %119 = vmatprep.mubr.f32.mxu0 %v452_v3  ;;  %190 = vmatprep.mubr.f32.mxu1 %v452_v3 }
   0x2   :  { %v405_v4 = vpack.c.bf16 %v37_v1, %v32_v0  ;;  %v36_v5 = vld [vmem:[%s631_s3 + $0x28] sm:$0xff]  ;;  %v34_v6 = vld [vmem:[%s631_s3 + $0x18] sm:$0xff]  ;;  %v39_v7 = vld [vmem:[%s631_s3 + $0x40] sm:$0xff] }
   0x3   :  { %v407_v8 = vpack.c.bf16 %v36_v5, %v31_v2  ;;  %v413_v9 = vpack.c.bf16 %v39_v7, %v34_v6  ;;  %v42_v10 = vld [vmem:[%s631_s3 + $0x58] sm:$0xff]  ;;  %v47_v11 = vld [vmem:[%s631_s3 + $0x80] sm:$0xff]  ;;  %v33_v12 = vld [vmem:[%s631_s3 + $0x10] sm:$0xff] }
   0x4   :  { %406 = vmatprep.subr.bf16.mxu0 %v405_v4  ;;  %v409_v13 = vpack.c.bf16 %v47_v11, %v42_v10  ;;  %v38_v14 = vld [vmem:[%s631_s3 + $0x38] sm:$0xff]  ;;  %v41_v15 = vld [vmem:[%s631_s3 + $0x50] sm:$0xff]  ;;  %v44_v19 = vld [vmem:[%s631_s3 + $0x68] sm:$0xff] }
   0x5   :  { %v46_v16 = vld [vmem:[%s631_s3 + $0x78] sm:$0xff]  ;;  %408 = vmatpush1.bf16.msra.mxu0 %v407_v8  ;;  %414 = vmatprep.subr.bf16.mxu1 %v413_v9  ;;  %v415_v17 = vpack.c.bf16 %v38_v14, %v33_v12  ;;  %v49_v20 = vld [vmem:[%s631_s3 + $0x90] sm:$0xff]  ;;  %v43_v22 = vld [vmem:[%s631_s3 + $0x60] sm:$0xff] }
   0x6   :  { %v411_v18 = vpack.c.bf16 %v46_v16, %v41_v15  ;;  %410 = vmatprep.subr.bf16.mxu0 %v409_v13  ;;  %v417_v21 = vpack.c.bf16 %v49_v20, %v44_v19  ;;  %v48_v23 = vld [vmem:[%s631_s3 + $0x88] sm:$0xff]  ;;  %v35_v24 = vld [vmem:[%s631_s3 + $0x20] sm:$0xff]  ;;  %v45_v30 = vld [vmem:[%s631_s3 + $0x70] sm:$0xff] }
   0x7   :  { %416 = vmatpush1.bf16.msra.mxu1 %v415_v17  ;;  %v419_v25 = vpack.c.bf16 %v48_v23, %v43_v22  ;;  %v40_v26 = vld [vmem:[%s631_s3 + $0x48] sm:$0xff]  ;;  %v30_v27 = vld [vmem:[%s632_s2] sm:$0xff]  ;;  %v50_v31 = vld [vmem:[%s631_s3 + $0x98] sm:$0xff] }
   0x8   :  { %418 = vmatprep.subr.bf16.mxu1 %v417_v21  ;;  %v422_v28 = vpack.c.bf16 %v40_v26, %v35_v24  ;;  %v425_v32 = vpack.c.bf16 %v50_v31, %v45_v30  ;;  %v546_v33 = vld [vmem:[%s633_s0] sm:$0xff]  ;;  %v551_v34 = vld [vmem:[%s633_s0 + $0x8] sm:$0xff]  ;;  %v557_v36 = vld [vmem:[%s633_s0 + $0x10] sm:$0xff] }
   0x9   :  { %412 = vmatpush1.bf16.msra.mxu0 %v411_v18  ;;  %v277_v35 = vand.u32 2147483647, %v546_v33  ;;  %v562_v37 = vld [vmem:[%s633_s0 + $0x18] sm:$0xff]  ;;  %v278_v38 = vand.u32 2147483647, %v551_v34  ;;  %v570_v43 = vld [vmem:[%s633_s0 + $0x20] sm:$0xff] }
   0xa   :  { %421 = vmatprep.subr.bf16.mxu0 %v453_v29  ;;  %v279_v39 = vand.u32 2147483647, %v557_v36  ;;  %v280_v41 = vand.u32 2147483647, %v562_v37  ;;  %v281_v47 = vand.u32 2147483647, %v570_v43 }
   0xb   :  { %420 = vmatpush1.bf16.msra.mxu1 %v419_v25  ;;  %v282_v40 = vsub.f32 0.0, %v277_v35  ;;  %v283_v42 = vsub.f32 0.0, %v278_v38  ;;  %v22_v2 = vld [vmem:[%s634_s1] sm:$0xff]  ;;  %v267_v7 = vsub.f32 0.0, %v546_v33  ;;  %v268_v15 = vsub.f32 0.0, %v551_v34 }
   0xc   :  { %386 = vmatmul.mubr.msk.f32.vlgmr.msra.gmra.mrb[0].mxu0 %vm51_vm0, %v30_v27  ;;  %v284_v44 = vsub.f32 0.0, %v279_v39  ;;  %v285_v46 = vsub.f32 0.0, %v280_v41  ;;  %v286_v51 = vsub.f32 0.0, %v281_v47  ;;  %v25_v10 = vunpack.c.l.bf16 %v22_v2 }
   0xd   :  { %423 = vmatpush3.bf16.msra.mxu0 %v422_v28  ;;  %402 = vmatprep.mubr.msk.f32.mxu0 %vm454_vm1, %v452_v3  ;;  %v287_v45 = vmul.f32 1.442695, %v282_v40  ;;  %v289_v48 = vmul.f32 1.442695, %v283_v42  ;;  %v272_v23 = vmax.f32 %v267_v7, 0.0  ;;  %v269_v26 = vsub.f32 0.0, %v557_v36 }
   0xe   :  { %387 = vmatmul.mubr.msk.f32.vlgmr.msra.gmra.mrb[0].mxu1 %vm51_vm0, %v30_v27  ;;  %424 = vmatprep.subr.bf16.mxu0 %v453_v29  ;;  %v291_v49 = vmul.f32 1.442695, %v284_v44  ;;  %v293_v50 = vmul.f32 1.442695, %v285_v46  ;;  %v295_v52 = vmul.f32 1.442695, %v286_v51 }
   0xf   :  { %432 = vpow2.f32 %v287_v45  ;;  %v23_v28 = vld [vmem:[%s634_s1 + $0x8] sm:$0xff]  ;;  %v270_v31 = vsub.f32 0.0, %v562_v37  ;;  %v273_v41 = vmax.f32 %v268_v15, 0.0 }
  0x10   :  { %434 = vpow2.f32 %v289_v48  ;;  %v27_v47 = vunpack.c.l.bf16 %v23_v28  ;;  %v274_v48 = vmax.f32 %v269_v26, 0.0  ;;  %v28_v51 = vunpack.c.h.bf16 %v23_v28 }
  0x11   :  { %426 = vmatpush3.bf16.msra.mxu0 %v425_v32  ;;  %436 = vpow2.f32 %v291_v49  ;;  %v26_v32 = vunpack.c.h.bf16 %v22_v2 }
  0x12   :  { %438 = vpow2.f32 %v293_v50  ;;  %v355_v2 = vmul.f32 %v28_v51, %v562_v37 }
  0x13   :  { %440 = vpow2.f32 %v295_v52  ;;  %v275_v52 = vmax.f32 %v270_v31, 0.0 }
  0x14   :  { %403 = vmatmul.mubr.msk.f32.vlgmr.msra.gmra.mrb[2].mxu0 %vm51_vm0, %v30_v27 }
  0x19   :  { %v433_v53 = vpop.eup %432 }
  0x1a   :  { %v435_v54 = vpop.eup %434  ;;  %v297_v56 = vadd.f32 1.0, %v433_v53  ;;  %v300_v63 = vmul.f32 -0.5, %v433_v53  ;;  %v303_v8 = vand.u32 2147483647, %v433_v53 }
  0x1b   :  { %v437_v55 = vpop.eup %436  ;;  %v306_v58 = vadd.f32 1.0, %v435_v54  ;;  %v309_v0 = vmul.f32 -0.5, %v435_v54  ;;  %v312_v11 = vand.u32 2147483647, %v435_v54 }
  0x1c   :  { %v439_v57 = vpop.eup %438  ;;  %v315_v59 = vadd.f32 1.0, %v437_v55  ;;  %442 = vlog2.f32 %v297_v56  ;;  %v318_v1 = vmul.f32 -0.5, %v437_v55  ;;  %v301_v5 = vadd.f32 1.0, %v300_v63 }
  0x1d   :  { %v324_v60 = vadd.f32 1.0, %v439_v57  ;;  %v573_v61 = vpop.eup %440  ;;  %444 = vlog2.f32 %v306_v58  ;;  %v327_v3 = vmul.f32 -0.5, %v439_v57  ;;  %v310_v6 = vadd.f32 1.0, %v309_v0 }
  0x1e   :  { %446 = vlog2.f32 %v315_v59  ;;  %v333_v62 = vadd.f32 1.0, %v573_v61  ;;  %v319_v12 = vadd.f32 1.0, %v318_v1  ;;  %v321_v16 = vand.u32 2147483647, %v437_v55  ;;  %v24_v59 = vld [vmem:[%s634_s1 + $0x10] sm:$0xf] }
  0x1f   :  { %448 = vlog2.f32 %v324_v60  ;;  %v328_v17 = vadd.f32 1.0, %v327_v3  ;;  %v302_v19 = vmul.f32 %v433_v53, %v301_v5  ;;  %v311_v20 = vmul.f32 %v435_v54, %v310_v6 }
  0x20   :  { %450 = vlog2.f32 %v333_v62  ;;  %v330_v21 = vand.u32 2147483647, %v439_v57  ;;  %v336_v22 = vmul.f32 -0.5, %v573_v61  ;;  %vm582_vm2 = vcmp.lt.f32.partialorder %v303_v8, 0.0004427343 }
  0x21   :  { %vm587_vm3 = vcmp.lt.f32.partialorder %v312_v11, 0.0004427343  ;;  %v320_v30 = vmul.f32 %v437_v55, %v319_v12  ;;  %vm595_vm4 = vcmp.lt.f32.partialorder %v321_v16, 0.0004427343  ;;  %v329_v39 = vmul.f32 %v439_v57, %v328_v17 }
  0x22   :  { %vm601_vm5 = vcmp.lt.f32.partialorder %v330_v21, 0.0004427343  ;;  %v337_v44 = vadd.f32 1.0, %v336_v22  ;;  %v339_v49 = vand.u32 2147483647, %v573_v61  ;;  %v352_v54 = vmul.f32 %v25_v10, %v546_v33 }
  0x23   :  { %v271_v56 = vsub.f32 0.0, %v570_v43  ;;  %v353_v58 = vmul.f32 %v26_v32, %v551_v34  ;;  %v354_v0 = vmul.f32 %v27_v47, %v557_v36 }
  0x24   :  { %v338_v62 = vmul.f32 %v573_v61, %v337_v44  ;;  %vm620_vm6 = vcmp.lt.f32.partialorder %v339_v49, 0.0004427343 }
  0x25   :  { %v276_v34 = vmax.f32 %v271_v56, 0.0 }
  0x26   :  { %v443_v4 = vpop.eup %442 }
  0x27   :  { %v445_v9 = vpop.eup %444  ;;  %v299_v14 = vmul.f32 0.6931472, %v443_v4  ;;  %v29_v4 = vunpack.c.l.bf16 %v24_v59 }
  0x28   :  { %v447_v13 = vpop.eup %446  ;;  %v308_v25 = vmul.f32 0.6931472, %v445_v9 }
  0x29   :  { %v449_v18 = vpop.eup %448  ;;  %v317_v29 = vmul.f32 0.6931472, %v447_v13  ;;  %v305_v40 = vsel %vm582_vm2, %v302_v19, %v299_v14  ;;  %v356_v12 = vmul.f32 %v29_v4, %v570_v43 }
  0x2a   :  { %v326_v38 = vmul.f32 0.6931472, %v449_v18  ;;  %v451_v45 = vpop.eup %450  ;;  %v314_v46 = vsel %vm587_vm3, %v311_v20, %v308_v25  ;;  %v342_v53 = vadd.f32 %v305_v40, %v272_v23 }
  0x2b   :  { %v323_v50 = vsel %vm595_vm4, %v320_v30, %v317_v29  ;;  %v343_v57 = vadd.f32 %v314_v46, %v273_v41  ;;  %v335_v60 = vmul.f32 0.6931472, %v451_v45 }
  0x2c   :  { %v332_v55 = vsel %vm601_vm5, %v329_v39, %v326_v38  ;;  %v344_v63 = vadd.f32 %v323_v50, %v274_v48  ;;  %v357_v3 = vadd.f32 %v352_v54, %v342_v53 }
  0x2d   :  { %v345_v1 = vadd.f32 %v332_v55, %v275_v52  ;;  %v358_v5 = vadd.f32 %v353_v58, %v343_v57  ;;  %v341_v6 = vsel %vm620_vm6, %v338_v62, %v335_v60 }
  0x2e   :  { %v359_v8 = vadd.f32 %v354_v0, %v344_v63  ;;  %v346_v11 = vadd.f32 %v341_v6, %v276_v34 }
  0x2f   :  { %v360_v9 = vadd.f32 %v355_v2, %v345_v1 }
  0x30   :  { %v361_v18 = vadd.f32 %v356_v12, %v346_v11 }
  0xdf   :  { %v121_v7 = vpop.f32.mrb[0].mxu0 }
  0xe0   :  { %vm347_vm7 = vcmp.gt.f32.partialorder %v121_v7, 0.5  ;;  %v123_v61 = vpop.f32.mrb[1].mxu0 }
  0xe1   :  { %v362_v36 = vsel %vm347_vm7, %v357_v3, 0.0  ;;  %vm348_vm8 = vcmp.gt.f32.partialorder %v123_v61, 0.5  ;;  %v192_v10 = vpop.f32.mrb[0].mxu1 }
  0xe2   :  { %v363_v13 = vsel %vm348_vm8, %v358_v5, 0.0  ;;  %vm349_vm9 = vcmp.gt.f32.partialorder %v192_v10, 0.5  ;;  %v194_v37 = vpop.f32.mrb[1].mxu1 }
  0xe3   :  { %v367_v14 = vadd.f32 %v363_v13, %v362_v36  ;;  %v364_v15 = vsel %vm349_vm9, %v359_v8, 0.0  ;;  %vm350_vm10 = vcmp.gt.f32.partialorder %v194_v37, 0.5 }
  0xe4   :  { %v365_v16 = vsel %vm350_vm10, %v360_v9, 0.0 }
  0xe5   :  { %v368_v17 = vadd.f32 %v367_v14, %v364_v15 }
  0xe7   :  { %v369_v19 = vadd.f32 %v368_v17, %v365_v16  ;;  %v263_v20 = vpop.f32.mrb[2].mxu0 }
  0xe8   :  { %vm351_vm11 = vcmp.gt.f32.partialorder %v263_v20, 0.5  ;;  %v404_v21 = vpop.f32.mrb[3].mxu0 }
  0xe9   :  { %v366_v22 = vsel %vm351_vm11, %v361_v18, 0.0 }
  0xea   :  { %v370_v23 = vadd.f32 %v369_v19, %v366_v22 }
  0xec   :  { %371 = vadd.xlane.f32.xlu0 %v370_v23 }
 0x179   :  { %v372_v24 = vpop.xlane.xlu0 %371 }
 0x17a   :  { %v373_v25 = vrot.slane %v372_v24, 4 }
 0x17c   :  { %v374_v26 = vadd.f32 %v373_v25, %v372_v24 }
 0x17e   :  { %v375_v43 = vrot.slane %v374_v26, 2 }
 0x180   :  { %v376_v27 = vadd.f32 %v375_v43, %v374_v26 }
 0x182   :  { %v377_v28 = vrot.slane %v376_v27, 1 }
 0x184   :  { %v378_v29 = vadd.f32 %v377_v28, %v376_v27 }
 0x186   :  { %427 = vpush %v378_v29 }
 0x1b7   :  { %s428_s1 = spop %427 }
 0x1b8   :  { %v380_v30 = vstv %s428_s1 }
 0x1b9   :  { %381 = vst [vmem:[%s635_s4] sm:$0xff] %v380_v30 }

</bundles_post_ra>
